<compile_context>
chip_gen: v5e
topology: v5e:2x2
jax: 0.10.0
libtpu: 0.0.40
codegen_flags: <defaults>
</compile_context>

<pallas_src>
import jax
import jax.numpy as jnp
from jax.experimental import pallas as pl
from jax.experimental.pallas import tpu as pltpu

BN_EPS = 1e-5


# ---------------------------------------------------------------------------
# Fused kernel: all 3 GLU sub-layers, one batch item per grid step.
# ---------------------------------------------------------------------------
def _glu_layer_kernel(x_ref, w0_ref, b0_ref, w1_ref, b1_ref, w2_ref, b2_ref, o_ref):
    T = x_ref.shape[-1]
    x = x_ref[0]                                        # (C_in, T)

    def im2col(v):
        # rows = [x[:, t-1] ; x[:, t] ; x[:, t+1]] with zero "same" padding, all in VMEM.
        C = v.shape[0]
        z = jnp.zeros((C, 1), jnp.float32)
        xm1 = jnp.concatenate([z, v[:, : T - 1]], axis=1)
        xp1 = jnp.concatenate([v[:, 1:], z], axis=1)
        return jnp.concatenate([xm1, v, xp1], axis=0)   # (3*C, T)

    # statically unrolled over the 3 sub-layers (shapes differ on the last one)
    for w_ref, b_ref in ((w0_ref, b0_ref), (w1_ref, b1_ref), (w2_ref, b2_ref)):
        c_pool = w_ref.shape[0] // 2                    # gate rows == lin rows
        n_out = c_pool // 2                             # pool_size == 2
        rhs = im2col(x)
        # one MXU matmul covers gate + lin convolutions and all 3 taps
        y = jnp.dot(w_ref[...], rhs, preferred_element_type=jnp.float32)
        y = y + b_ref[...]                              # folded conv-bias + BN shift
        gate = jax.nn.sigmoid(y[:c_pool, :])
        lin = y[c_pool:, :]
        gl = gate * lin                                 # (c_pool, T)
        # MaxPool1d(kernel=2) over channels: rows were permuted so the pool pairs
        # (2c, 2c+1) are the two contiguous halves.
        x = jnp.maximum(gl[:n_out, :], gl[n_out:, :])   # (n_out, T)

    o_ref[0] = x


@jax.jit
def glu_layer_forward(x, w0, b0, w1, b1, w2, b2):
    """x: (B, n_input, T) f32 -> (B, n_output, T) f32."""
    B, C_in, T = x.shape
    n_output = w2.shape[0] // 4            # 2 branches * pool_size(=2) * n_output (static)
    return pl.pallas_call(
        _glu_layer_kernel,
        out_shape=jax.ShapeDtypeStruct((B, n_output, T), jnp.float32),
        grid_spec=pltpu.PrefetchScalarGridSpec(
            num_scalar_prefetch=0,
            grid=(B,),
            in_specs=[
                pl.BlockSpec((1, C_in, T), lambda b: (b, 0, 0)),
                pl.BlockSpec(w0.shape, lambda b: (0, 0)),
                pl.BlockSpec(b0.shape, lambda b: (0, 0)),
                pl.BlockSpec(w1.shape, lambda b: (0, 0)),
                pl.BlockSpec(b1.shape, lambda b: (0, 0)),
                pl.BlockSpec(w2.shape, lambda b: (0, 0)),
                pl.BlockSpec(b2.shape, lambda b: (0, 0)),
            ],
            out_specs=pl.BlockSpec((1, n_output, T), lambda b: (b, 0, 0)),
        ),
        compiler_params=pltpu.CompilerParams(dimension_semantics=("parallel",)),
    )(x, w0, b0, w1, b1, w2, b2)


# ---------------------------------------------------------------------------
# Parameter construction (deterministic, synthetic) + BN/conv folding.
# ---------------------------------------------------------------------------
def make_glu_layer_params(key, n_input, n_output, n_sublayers=3, pool_size=2, eps=BN_EPS):
    """Returns (raw, folded).

    raw:    per sub-layer (Wg, bg, bn_g, Wl, bl, bn_l) in PyTorch layout
            (Conv1d weight (C_out, C_in, k)), used by the pure-JAX reference.
    folded: per sub-layer (W_stacked, b_stacked) consumed by the kernel:
            W_stacked (2*C_pool, 3*C_in): rows = [gate | lin], channel-permuted,
            BN scale folded in; columns = taps [t-1 | t | t+1].
            b_stacked (2*C_pool, 1)     = (conv_bias - running_mean)*scale + beta.
    """
    # TODO(synk): ConvTranspose1d branch (n_input < n_output) is not exercised by this
    # config; it maps onto the same kernel with taps W_ct[:, :, 2-j].T at build time.
    # TODO(synk): training-mode BatchNorm1d (batch statistics) is not implemented;
    # eval-mode running statistics are folded into the weights.
    assert n_input >= n_output, "example uses the Conv1d branch (n_input >= n_output)"
    raw, folded = [], []
    sub_keys = jax.random.split(key, n_sublayers)
    for n in range(n_sublayers):
        n_out = n_output if n == n_sublayers - 1 else n_input
        c_pool = pool_size * n_out
        ks = jax.random.split(sub_keys[n], 6)

        def conv(kw, kb):
            W = 0.1 * jax.random.normal(kw, (c_pool, n_input, 3), jnp.float32)
            b = 0.1 * jax.random.normal(kb, (c_pool,), jnp.float32)
            return W, b

        def bn(k):
            k0, k1, k2, k3 = jax.random.split(k, 4)
            gamma = 1.0 + 0.1 * jax.random.normal(k0, (c_pool,), jnp.float32)
            beta = 0.1 * jax.random.normal(k1, (c_pool,), jnp.float32)
            mean = 0.1 * jax.random.normal(k2, (c_pool,), jnp.float32)
            var = 1.0 + 0.1 * jnp.abs(jax.random.normal(k3, (c_pool,), jnp.float32))
            return gamma, beta, mean, var

        Wg, bg = conv(ks[0], ks[1])
        Wl, bl = conv(ks[2], ks[3])
        bn_g, bn_l = bn(ks[4]), bn(ks[5])
        raw.append((Wg, bg, bn_g, Wl, bl, bn_l))

        # channel permutation so pool pairs (2c, 2c+1) become the two contiguous halves
        perm = jnp.concatenate([jnp.arange(0, c_pool, 2), jnp.arange(1, c_pool, 2)])

        def fold(W, b, bn_p):
            gamma, beta, mean, var = bn_p
            scale = gamma / jnp.sqrt(var + eps)
            Wf = (W * scale[:, None, None])[perm]             # BN scale folded into taps
            shift = ((b - mean) * scale + beta)[perm]
            # (c_pool, C_in, 3) -> (c_pool, 3*C_in) with column blocks [t-1 | t | t+1]
            lhs = jnp.concatenate([Wf[:, :, 0], Wf[:, :, 1], Wf[:, :, 2]], axis=1)
            return lhs, shift

        lhs_g, sh_g = fold(Wg, bg, bn_g)
        lhs_l, sh_l = fold(Wl, bl, bn_l)
        W_stacked = jnp.concatenate([lhs_g, lhs_l], axis=0)            # (2*c_pool, 3*C_in)
        b_stacked = jnp.concatenate([sh_g, sh_l], axis=0)[:, None]     # (2*c_pool, 1)
        folded.append((W_stacked, b_stacked))
    return raw, folded


# ---------------------------------------------------------------------------
# Pure-JAX reference mirroring GLULayer.forward (eval-mode BatchNorm).
# ---------------------------------------------------------------------------
def _ref_conv1d(x, W, b):
    B, C_in, T = x.shape
    xp = jnp.pad(x, ((0, 0), (0, 0), (1, 1)))
    y = b[None, :, None]
    for j in range(3):
        y = y + jnp.einsum("oi,bit->bot", W[:, :, j], xp[:, :, j:j + T],
                           precision=jax.lax.Precision.HIGHEST)
    return y


def _ref_bn(y, bn_p, eps):
    gamma, beta, mean, var = bn_p
    s = (gamma / jnp.sqrt(var + eps))[None, :, None]
    return (y - mean[None, :, None]) * s + beta[None, :, None]


def glu_layer_reference(x, raw_params, eps=BN_EPS):
    for Wg, bg, bn_g, Wl, bl, bn_l in raw_params:
        G = jax.nn.sigmoid(_ref_bn(_ref_conv1d(x, Wg, bg), bn_g, eps))
        L = _ref_bn(_ref_conv1d(x, Wl, bl), bn_l, eps)
        y = G * L
        B, C, T = y.shape
        x = y.reshape(B, C // 2, 2, T).max(axis=2)   # MaxPool1d(2) over channel dim
    return x


if __name__ == "__main__":
    key = jax.random.PRNGKey(0)
    kx, kp = jax.random.split(key)

    # small shapes; T is a multiple of 128 so output stores are lane-dense
    B, n_input, n_output, T = 2, 16, 8, 128

    x = jax.random.normal(kx, (B, n_input, T), jnp.float32)
    raw, folded = make_glu_layer_params(kp, n_input, n_output)
    (w0, b0), (w1, b1), (w2, b2) = folded

    out = glu_layer_forward(x, w0, b0, w1, b1, w2, b2)
    out = jax.block_until_ready(out)

    assert out.shape == (B, n_output, T)
    assert bool(jnp.all(jnp.isfinite(out)))

    ref = glu_layer_reference(x, raw)
    max_err = float(jnp.max(jnp.abs(out - ref)))
    assert max_err < 5e-2, f"max abs err vs reference: {max_err}"

    print("KERNEL_OK")
</pallas_src>

<mosaic_0001>
module attributes {stable_mosaic.version = 11 : i64} {
  func.func @_glu_layer_kernel(%arg0: i32, %arg1: memref<1x16x128xf32, #tpu.memory_space<vmem>>, %arg2: memref<64x48xf32, #tpu.memory_space<vmem>>, %arg3: memref<64x1xf32, #tpu.memory_space<vmem>>, %arg4: memref<64x48xf32, #tpu.memory_space<vmem>>, %arg5: memref<64x1xf32, #tpu.memory_space<vmem>>, %arg6: memref<32x48xf32, #tpu.memory_space<vmem>>, %arg7: memref<32x1xf32, #tpu.memory_space<vmem>>, %arg8: memref<1x8x128xf32, #tpu.memory_space<vmem>>) attributes {dimension_semantics = [#tpu.dimension_semantics<parallel>], iteration_bounds = array<i64: 2>, scalar_prefetch = 0 : i64, scratch_operands = 0 : i64, tpu.core_type = #tpu.core_type<tc>, window_params = [{transform_indices = @transform_0, window_bounds = array<i64: 1, 16, 128>}, {pipeline_mode = #tpu.pipeline_mode<synchronous>, transform_indices = @transform_1, window_bounds = array<i64: 64, 48>}, {pipeline_mode = #tpu.pipeline_mode<synchronous>, transform_indices = @transform_2, window_bounds = array<i64: 64, 1>}, {pipeline_mode = #tpu.pipeline_mode<synchronous>, transform_indices = @transform_3, window_bounds = array<i64: 64, 48>}, {pipeline_mode = #tpu.pipeline_mode<synchronous>, transform_indices = @transform_4, window_bounds = array<i64: 64, 1>}, {pipeline_mode = #tpu.pipeline_mode<synchronous>, transform_indices = @transform_5, window_bounds = array<i64: 32, 48>}, {pipeline_mode = #tpu.pipeline_mode<synchronous>, transform_indices = @transform_6, window_bounds = array<i64: 32, 1>}, {transform_indices = @transform_7, window_bounds = array<i64: 1, 8, 128>}]} {
    %c0 = arith.constant 0 : index
    %c0_0 = arith.constant 0 : index
    %c0_1 = arith.constant 0 : index
    %0 = vector.load %arg1[%c0, %c0_0, %c0_1] : memref<1x16x128xf32, #tpu.memory_space<vmem>>, vector<1x16x128xf32>
    %1 = vector.shape_cast %0 : vector<1x16x128xf32> to vector<16x128xf32>
    %cst = arith.constant 0.000000e+00 : f32
    %2 = vector.broadcast %cst : f32 to vector<16x1xf32>
    %3 = vector.extract_strided_slice %1 {offsets = [0, 0], sizes = [16, 127], strides = [1, 1]} : vector<16x128xf32> to vector<16x127xf32>
    %4 = tpu.concatenate %2, %3 in 1 : vector<16x1xf32>, vector<16x127xf32> -> vector<16x128xf32>
    %5 = vector.extract_strided_slice %1 {offsets = [0, 1], sizes = [16, 127], strides = [1, 1]} : vector<16x128xf32> to vector<16x127xf32>
    %6 = tpu.concatenate %5, %2 in 1 : vector<16x127xf32>, vector<16x1xf32> -> vector<16x128xf32>
    %7 = tpu.concatenate %4, %1, %6 in 0 : vector<16x128xf32>, vector<16x128xf32>, vector<16x128xf32> -> vector<48x128xf32>
    %c0_2 = arith.constant 0 : index
    %c0_3 = arith.constant 0 : index
    %8 = vector.load %arg2[%c0_2, %c0_3] : memref<64x48xf32, #tpu.memory_space<vmem>>, vector<64x48xf32>
    %cst_4 = arith.constant dense<0.000000e+00> : vector<64x128xf32>
    %9 = tpu.matmul %8, %7, %cst_4 {dimension_numbers = #tpu.dot_dimension_numbers<[1], [0], [0], [1], [0, 0, 1, 1], [], []>} : vector<64x48xf32>, vector<48x128xf32>, vector<64x128xf32> -> vector<64x128xf32>
    %c0_5 = arith.constant 0 : index
    %c0_6 = arith.constant 0 : index
    %10 = vector.load %arg3[%c0_5, %c0_6] : memref<64x1xf32, #tpu.memory_space<vmem>>, vector<64x1xf32>
    %11 = vector.broadcast %10 : vector<64x1xf32> to vector<64x128xf32>
    %12 = arith.addf %9, %11 : vector<64x128xf32>
    %13 = vector.extract_strided_slice %12 {offsets = [0, 0], sizes = [32, 128], strides = [1, 1]} : vector<64x128xf32> to vector<32x128xf32>
    %14 = arith.negf %13 : vector<32x128xf32>
    %15 = math.exp %14 : vector<32x128xf32>
    %cst_7 = arith.constant 1.000000e+00 : f32
    %16 = vector.broadcast %cst_7 : f32 to vector<32x128xf32>
    %17 = arith.addf %16, %15 : vector<32x128xf32>
    %18 = arith.divf %16, %17 : vector<32x128xf32>
    %19 = vector.extract_strided_slice %12 {offsets = [32, 0], sizes = [32, 128], strides = [1, 1]} : vector<64x128xf32> to vector<32x128xf32>
    %20 = arith.mulf %18, %19 : vector<32x128xf32>
    %21 = vector.extract_strided_slice %20 {offsets = [0, 0], sizes = [16, 128], strides = [1, 1]} : vector<32x128xf32> to vector<16x128xf32>
    %22 = vector.extract_strided_slice %20 {offsets = [16, 0], sizes = [16, 128], strides = [1, 1]} : vector<32x128xf32> to vector<16x128xf32>
    %23 = arith.maximumf %21, %22 : vector<16x128xf32>
    %cst_8 = arith.constant 0.000000e+00 : f32
    %24 = vector.broadcast %cst_8 : f32 to vector<16x1xf32>
    %25 = vector.extract_strided_slice %23 {offsets = [0, 0], sizes = [16, 127], strides = [1, 1]} : vector<16x128xf32> to vector<16x127xf32>
    %26 = tpu.concatenate %24, %25 in 1 : vector<16x1xf32>, vector<16x127xf32> -> vector<16x128xf32>
    %27 = vector.extract_strided_slice %23 {offsets = [0, 1], sizes = [16, 127], strides = [1, 1]} : vector<16x128xf32> to vector<16x127xf32>
    %28 = tpu.concatenate %27, %24 in 1 : vector<16x127xf32>, vector<16x1xf32> -> vector<16x128xf32>
    %29 = tpu.concatenate %26, %23, %28 in 0 : vector<16x128xf32>, vector<16x128xf32>, vector<16x128xf32> -> vector<48x128xf32>
    %c0_9 = arith.constant 0 : index
    %c0_10 = arith.constant 0 : index
    %30 = vector.load %arg4[%c0_9, %c0_10] : memref<64x48xf32, #tpu.memory_space<vmem>>, vector<64x48xf32>
    %cst_11 = arith.constant dense<0.000000e+00> : vector<64x128xf32>
    %31 = tpu.matmul %30, %29, %cst_11 {dimension_numbers = #tpu.dot_dimension_numbers<[1], [0], [0], [1], [0, 0, 1, 1], [], []>} : vector<64x48xf32>, vector<48x128xf32>, vector<64x128xf32> -> vector<64x128xf32>
    %c0_12 = arith.constant 0 : index
    %c0_13 = arith.constant 0 : index
    %32 = vector.load %arg5[%c0_12, %c0_13] : memref<64x1xf32, #tpu.memory_space<vmem>>, vector<64x1xf32>
    %33 = vector.broadcast %32 : vector<64x1xf32> to vector<64x128xf32>
    %34 = arith.addf %31, %33 : vector<64x128xf32>
    %35 = vector.extract_strided_slice %34 {offsets = [0, 0], sizes = [32, 128], strides = [1, 1]} : vector<64x128xf32> to vector<32x128xf32>
    %36 = arith.negf %35 : vector<32x128xf32>
    %37 = math.exp %36 : vector<32x128xf32>
    %cst_14 = arith.constant 1.000000e+00 : f32
    %38 = vector.broadcast %cst_14 : f32 to vector<32x128xf32>
    %39 = arith.addf %38, %37 : vector<32x128xf32>
    %40 = arith.divf %38, %39 : vector<32x128xf32>
    %41 = vector.extract_strided_slice %34 {offsets = [32, 0], sizes = [32, 128], strides = [1, 1]} : vector<64x128xf32> to vector<32x128xf32>
    %42 = arith.mulf %40, %41 : vector<32x128xf32>
    %43 = vector.extract_strided_slice %42 {offsets = [0, 0], sizes = [16, 128], strides = [1, 1]} : vector<32x128xf32> to vector<16x128xf32>
    %44 = vector.extract_strided_slice %42 {offsets = [16, 0], sizes = [16, 128], strides = [1, 1]} : vector<32x128xf32> to vector<16x128xf32>
    %45 = arith.maximumf %43, %44 : vector<16x128xf32>
    %cst_15 = arith.constant 0.000000e+00 : f32
    %46 = vector.broadcast %cst_15 : f32 to vector<16x1xf32>
    %47 = vector.extract_strided_slice %45 {offsets = [0, 0], sizes = [16, 127], strides = [1, 1]} : vector<16x128xf32> to vector<16x127xf32>
    %48 = tpu.concatenate %46, %47 in 1 : vector<16x1xf32>, vector<16x127xf32> -> vector<16x128xf32>
    %49 = vector.extract_strided_slice %45 {offsets = [0, 1], sizes = [16, 127], strides = [1, 1]} : vector<16x128xf32> to vector<16x127xf32>
    %50 = tpu.concatenate %49, %46 in 1 : vector<16x127xf32>, vector<16x1xf32> -> vector<16x128xf32>
    %51 = tpu.concatenate %48, %45, %50 in 0 : vector<16x128xf32>, vector<16x128xf32>, vector<16x128xf32> -> vector<48x128xf32>
    %c0_16 = arith.constant 0 : index
    %c0_17 = arith.constant 0 : index
    %52 = vector.load %arg6[%c0_16, %c0_17] : memref<32x48xf32, #tpu.memory_space<vmem>>, vector<32x48xf32>
    %cst_18 = arith.constant dense<0.000000e+00> : vector<32x128xf32>
    %53 = tpu.matmul %52, %51, %cst_18 {dimension_numbers = #tpu.dot_dimension_numbers<[1], [0], [0], [1], [0, 0, 1, 1], [], []>} : vector<32x48xf32>, vector<48x128xf32>, vector<32x128xf32> -> vector<32x128xf32>
    %c0_19 = arith.constant 0 : index
    %c0_20 = arith.constant 0 : index
    %54 = vector.load %arg7[%c0_19, %c0_20] : memref<32x1xf32, #tpu.memory_space<vmem>>, vector<32x1xf32>
    %55 = vector.broadcast %54 : vector<32x1xf32> to vector<32x128xf32>
    %56 = arith.addf %53, %55 : vector<32x128xf32>
    %57 = vector.extract_strided_slice %56 {offsets = [0, 0], sizes = [16, 128], strides = [1, 1]} : vector<32x128xf32> to vector<16x128xf32>
    %58 = arith.negf %57 : vector<16x128xf32>
    %59 = math.exp %58 : vector<16x128xf32>
    %cst_21 = arith.constant 1.000000e+00 : f32
    %60 = vector.broadcast %cst_21 : f32 to vector<16x128xf32>
    %61 = arith.addf %60, %59 : vector<16x128xf32>
    %62 = arith.divf %60, %61 : vector<16x128xf32>
    %63 = vector.extract_strided_slice %56 {offsets = [16, 0], sizes = [16, 128], strides = [1, 1]} : vector<32x128xf32> to vector<16x128xf32>
    %64 = arith.mulf %62, %63 : vector<16x128xf32>
    %65 = vector.extract_strided_slice %64 {offsets = [0, 0], sizes = [8, 128], strides = [1, 1]} : vector<16x128xf32> to vector<8x128xf32>
    %66 = vector.extract_strided_slice %64 {offsets = [8, 0], sizes = [8, 128], strides = [1, 1]} : vector<16x128xf32> to vector<8x128xf32>
    %67 = arith.maximumf %65, %66 : vector<8x128xf32>
    %c0_22 = arith.constant 0 : index
    %c0_23 = arith.constant 0 : index
    %c0_24 = arith.constant 0 : index
    %68 = vector.load %arg8[%c0_22, %c0_23, %c0_24] : memref<1x8x128xf32, #tpu.memory_space<vmem>>, vector<1x8x128xf32>
    %69 = vector.shape_cast %68 : vector<1x8x128xf32> to vector<8x128xf32>
    %70 = vector.shape_cast %67 : vector<8x128xf32> to vector<1x8x128xf32>
    tpu.vector_store %arg8[%c0_22, %c0_23, %c0_24], %70 {strides = array<i32>} : memref<1x8x128xf32, #tpu.memory_space<vmem>>, vector<1x8x128xf32>,
    return
  }
  func.func @transform_0(%arg0: i32) -> (i32, i32, i32) {
    %c0_i32 = arith.constant 0 : i32
    %c0_i32_0 = arith.constant 0 : i32
    %c0_i32_1 = arith.constant 0 : i32
    return %arg0, %c0_i32, %c0_i32_0 : i32, i32, i32
  }
  func.func @transform_1(%arg0: i32) -> (i32, i32) {
    %c0_i32 = arith.constant 0 : i32
    %c0_i32_0 = arith.constant 0 : i32
    %c0_i32_1 = arith.constant 0 : i32
    return %c0_i32, %c0_i32_0 : i32, i32
  }
  func.func @transform_2(%arg0: i32) -> (i32, i32) {
    %c0_i32 = arith.constant 0 : i32
    %c0_i32_0 = arith.constant 0 : i32
    %c0_i32_1 = arith.constant 0 : i32
    return %c0_i32, %c0_i32_0 : i32, i32
  }
  func.func @transform_3(%arg0: i32) -> (i32, i32) {
    %c0_i32 = arith.constant 0 : i32
    %c0_i32_0 = arith.constant 0 : i32
    %c0_i32_1 = arith.constant 0 : i32
    return %c0_i32, %c0_i32_0 : i32, i32
  }
  func.func @transform_4(%arg0: i32) -> (i32, i32) {
    %c0_i32 = arith.constant 0 : i32
    %c0_i32_0 = arith.constant 0 : i32
    %c0_i32_1 = arith.constant 0 : i32
    return %c0_i32, %c0_i32_0 : i32, i32
  }
  func.func @transform_5(%arg0: i32) -> (i32, i32) {
    %c0_i32 = arith.constant 0 : i32
    %c0_i32_0 = arith.constant 0 : i32
    %c0_i32_1 = arith.constant 0 : i32
    return %c0_i32, %c0_i32_0 : i32, i32
  }
  func.func @transform_6(%arg0: i32) -> (i32, i32) {
    %c0_i32 = arith.constant 0 : i32
    %c0_i32_0 = arith.constant 0 : i32
    %c0_i32_1 = arith.constant 0 : i32
    return %c0_i32, %c0_i32_0 : i32, i32
  }
  func.func @transform_7(%arg0: i32) -> (i32, i32, i32) {
    %c0_i32 = arith.constant 0 : i32
    %c0_i32_0 = arith.constant 0 : i32
    %c0_i32_1 = arith.constant 0 : i32
    return %arg0, %c0_i32, %c0_i32_0 : i32, i32, i32
  }
}

</mosaic_0001>

<bundles_post_ra>
// kernel: glu_layer_forward.1
= control target key start
LH: loop header
LB: loop body
LE: loop exit
PB: predicated region body
PF: predicated region fallthrough
CT: control target
= control target key end

     0   :  { %12 = vsyncpa [#allocation3], 0  ;;  %s1563_s0 = inlined_call_operand.vmem [shape: f32[2,16,128], index: 0, kind: input, shape index: {}]   ;;  %s1564_s1 = inlined_call_operand.vmem [shape: f32[64,48], index: 1, kind: input, shape index: {}]   ;;  %s1565_s2 = inlined_call_operand.vmem [shape: f32[64,1], index: 2, kind: input, shape index: {}]   ;;  %s1566_s3 = inlined_call_operand.vmem [shape: f32[64,48], index: 3, kind: input, shape index: {}]   ;;  %s1567_s4 = inlined_call_operand.vmem [shape: f32[64,1], index: 4, kind: input, shape index: {}]   ;;  %s1568_s5 = inlined_call_operand.vmem [shape: f32[32,48], index: 5, kind: input, shape index: {}]   ;;  %s1569_s6 = inlined_call_operand.vmem [shape: f32[32,1], index: 6, kind: input, shape index: {}]   ;;  %s1570_s7 = inlined_call_operand.hbm [shape: f32[2,8,128], index: 7, kind: output, shape index: {}]  }
   0x1   :  { %14 = vsyncpa [#allocation3 + $0x1], 0  ;;  %s1198_s24 = smov 0   ;;  %s1200_s25 = smov 0  }
   0x2   :  { %s1202_s26 = smov 0   ;;  %s1204_s27 = smov 0  }
   0x3 LB: > { %s1219_s28 = sadd.s32 4294967295, %s1153_s27   ;;  %s928_s29 = sadd.s32 4294967294, %s1153_s27   ;;  %s1153_s27 = sphi %s1204_s27, %s1588_s27   ;;  %s1149_s26 = sphi %s1202_s26, %s1587_s26   ;;  %s1145_s25 = sphi %s1200_s25, %s1586_s25   ;;  %s1141_s24 = sphi %s1198_s24, %s1585_s24  }
   0x4   : > { %s1223_s30 = sadd.s32 1, %s1153_s27   ;;  %s179_s8 = sadd.s32 1, %s1149_s26 }
   0x5   : > { %s176_s9 = ssub.s32 %s1153_s27, %s1223_s30  ;;  %p189_p0 = scmp.ne.s32.totalorder %s1149_s26, %s1145_s25 }
   0x6   : > { %p177_p1 = scmp.eq.s32.totalorder %s176_s9, 0  ;;  %p190_p2 = scmp.eq.s32.totalorder %s1219_s28, 1 }
   0x7   : > { %p195_p3 = scmp.ne.s32.totalorder %s1145_s25, %s1141_s24  ;;  %p196_p4 = scmp.eq.s32.totalorder %s928_s29, 1 }
   0x8   : > { %s1234_s10 = scalar_select %p177_p1, %s1149_s26, %s179_s8  }
   0x9   : > { %p1236_p5 = por %p190_p2, %p189_p0  ;;  %p1240_p6 = por %p196_p4, %p195_p3 }
   0xa   : > { %p931_p7 = scmp.ge.s32.totalorder %s1153_s27, 1  ;;  %p240_p8 = scmp.lt.s32.totalorder %s1153_s27, 3 }
   0xc   : > { %p241_p9 = pnand %p931_p7, %p240_p8 }
   0xd   : > { %p272_p10 = scmp.lt.s32.totalorder (!%p241_p9), %s1219_s28, 1  ;;  %s1155_s18 = smov (!%p241_p9), 127  }
   0xe   : > { %244 = sbr.rel (%p241_p9) target bundleno = 953 (0x3b9), region = 48  ;;  %s1156_s19 = smov (!%p241_p9), 1  }
   0xf   : > { %s269_s9 = sand.u32 (!%p241_p9), 1, %s1145_s25   ;;  %s1111_s8 = scalar_lea.hbm (!%p241_p9), %s1570_s7, 16 }
  0x10   : > { %s854_s20 = scalar_lea.sflag (!%p241_p9), [#allocation3], %s269_s9 }
  0x13   : > { %s273_s13 = scalar_select %p272_p10, %s1219_s28, 1  ;;  %v307_v2 = vld [vmem:[%s1565_s2] sm:$0xff]  ;;  %v1157_v3 = vmov 0   ;;  %vm296_vm0 = vcmask 1039360   ;;  %vm287_vm1 = vcmask 7168   ;;  %v308_v7 = vld [vmem:[%s1565_s2 + $0x8] sm:$0xff] }
  0x14   : > { %1049 = vset.pattern.permute.xlu0 %v1157_v3  ;;  %1050 = vset.pattern.permute.xlu1 %v1157_v3  ;;  %v309_v8 = vld [vmem:[%s1565_s2 + $0x10] sm:$0xff]  ;;  %vm1270_vm2 = vmneg %vm287_vm1  ;;  %v299_v11 = vld [vmem:[%s1564_s1] sm:$0xff]  ;;  %vm355_vm3 = vcmask 392192  }
  0x15   : > { %s987_s14 = sshll.u32 %s273_s13, 4  ;;  %1048 = vset.pattern.permute.xlu2 %v1157_v3  ;;  %v304_v12 = vld [vmem:[%s1564_s1 + $0x28] sm:$0xff]  ;;  %v305_v13 = vld [vmem:[%s1564_s1 + $0x30] sm:$0xff]  ;;  %v310_v14 = vld [vmem:[%s1565_s2 + $0x18] sm:$0xff]  ;;  %s1525_s13 = sshll.u32 %s269_s9, 3 }
  0x16   : > { %s276_s17 = scalar_lea.vmem %s1563_s0, %s987_s14  ;;  %322 = vperm.xlu2 %1048, %v308_v7   ;;  %v314_v15 = vld [vmem:[%s1565_s2 + $0x38] sm:$0xff]  ;;  %v313_v16 = vld [vmem:[%s1565_s2 + $0x30] sm:$0xff]  ;;  %v300_v17 = vld [vmem:[%s1564_s1 + $0x8] sm:$0xff]  ;;  %s984_s14 = sshll.u32 %s1219_s28, 3 }
  0x17   : > { %v278_v0 = vld [vmem:[%s276_s17 + $0x8] sm:$0xff]  ;;  %v277_v1 = vld [vmem:[%s276_s17] sm:$0xff]  ;;  %v306_v18 = vld [vmem:[%s1564_s1 + $0x38] sm:$0xff]  ;;  %s864_s17 = scalar_lea.hbm %s1570_s7, %s984_s14  ;;  %s271_s28 = scalar_lea.vmem [#allocation2], %s1525_s13 }
  0x18   : > { %292 = vrot.lane.b32.xlu0 %v278_v0, %s1155_s18  ;;  %283 = vrot.lane.b32.xlu1 %v278_v0, %s1156_s19  ;;  %v312_v19 = vld [vmem:[%s1565_s2 + $0x28] sm:$0xff]  ;;  %v301_v20 = vld [vmem:[%s1564_s1 + $0x10] sm:$0xff] }
  0x19   : > { %v311_v21 = vld [vmem:[%s1565_s2 + $0x20] sm:$0xff]  ;;  %v302_v22 = vld [vmem:[%s1564_s1 + $0x18] sm:$0xff] }
  0x1a   : > { %v303_v23 = vld [vmem:[%s1564_s1 + $0x20] sm:$0xff] }
  0x1e   : > { %332 = vperm.xlu2 %1048, %v310_v14  }
  0x20   : > { %290 = vrot.lane.b32.xlu0 %v277_v1, %s1155_s18  ;;  %281 = vrot.lane.b32.xlu1 %v277_v1, %s1156_s19 }
  0x26   : > { %342 = vperm.xlu2 %1048, %v312_v19  }
  0x28   : > { %317 = vperm.xlu0 %1049, %v307_v2   ;;  %327 = vperm.xlu1 %1050, %v309_v8  }
  0x2e   : > { %337 = vperm.xlu2 %1048, %v311_v21  }
  0x30   : > { %347 = vperm.xlu0 %1049, %v313_v16   ;;  %352 = vperm.xlu1 %1050, %v314_v15  }
  0x70   : > { %v323_v28 = vpop.permute.xlu2 %322 }
  0x78   : > { %v333_v40 = vpop.permute.xlu2 %332 }
  0x80   : > { %v1338_v50 = vpop.permute.xlu2 %342 }
  0x8a   : > { %v293_v4 = vpop.permute.xlu0 %292  ;;  %v284_v5 = vpop.permute.xlu1 %283 }
  0x8b   : > { %935 = vmatpush.msk.msra.mxu0 %vm296_vm0, %v293_v4  ;;  %988 = vmatpush.msk.msra.mxu2 %vm296_vm0, %v293_v4 }
  0x8c   : > { %989 = vmatpush.msk.msra.mxu3 %vm296_vm0, %v293_v4 }
  0x92   : > { %v291_v6 = vpop.permute.xlu0 %290  ;;  %v282_v10 = vpop.permute.xlu1 %281 }
  0x93   : > { %936 = vmatpush.msk.msra.mxu0 %vm296_vm0, %v291_v6  ;;  %990 = vmatpush.msk.msra.mxu2 %vm296_vm0, %v291_v6 }
  0x94   : > { %991 = vmatpush.msk.msra.mxu3 %vm296_vm0, %v291_v6 }
  0x95   : > { %392 = vmatpush.msra.mxu0 %v278_v0  ;;  %992 = vmatpush.msra.mxu2 %v278_v0 }
  0x96   : > { %993 = vmatpush.msra.mxu3 %v278_v0 }
  0x97   : > { %393 = vmatpush.msra.mxu0 %v277_v1  ;;  %994 = vmatpush.msra.mxu2 %v277_v1 }
  0x98   : > { %995 = vmatpush.msra.mxu3 %v277_v1 }
  0x99   : > { %938 = vmatpush.msk.msra.mxu0 %vm1270_vm2, %v284_v5  ;;  %996 = vmatpush.msk.msra.mxu2 %vm1270_vm2, %v284_v5 }
  0x9a   : > { %997 = vmatpush.msk.msra.mxu3 %vm1270_vm2, %v284_v5  ;;  %v318_v24 = vpop.permute.xlu0 %317  ;;  %v328_v34 = vpop.permute.xlu1 %327 }
  0x9b   : > { %940 = vmatpush.msk.msra.mxu0 %vm1270_vm2, %v282_v10  ;;  %998 = vmatpush.msk.msra.mxu2 %vm1270_vm2, %v282_v10  ;;  %v338_v5 = vpop.permute.xlu2 %337 }
  0x9c   : > { %999 = vmatpush.msk.msra.mxu3 %vm1270_vm2, %v282_v10  ;;  %941 = vmatmul.msk.f32.vlgmr.msra.gmra.mxu0 %vm355_vm3, %v299_v11 }
  0x9d   : > { %946 = vmatmul.msk.f32.vlgmr.msra.gmra.mxu2 %vm355_vm3, %v304_v12  ;;  %947 = vmatmul.msk.f32.vlgmr.msra.gmra.mxu3 %vm355_vm3, %v305_v13 }
  0xa2   : > { %v348_v60 = vpop.permute.xlu0 %347 }
  0xa4   : > { %942 = vmatmul.msk.f32.gmra.mxu0 %vm355_vm3, %v300_v17 }
  0xa5   : > { %948 = vmatmul.msk.f32.gmra.mxu3 %vm355_vm3, %v306_v18 }
  0xac   : > { %943 = vmatmul.msk.f32.gmra.mxu0 %vm355_vm3, %v301_v20 }
  0xb4   : > { %944 = vmatmul.msk.f32.gmra.mxu0 %vm355_vm3, %v302_v22 }
  0xbc   : > { %945 = vmatmul.msk.f32.gmra.mxu0 %vm355_vm3, %v303_v23 }
 0x119   : > { %v397_v25 = vpop.f32.mrf.mxu0 }
 0x11a   : > { %v398_v26 = vadd.f32 %v397_v25, %v318_v24 }
 0x11c   : > { %v949_v27 = vmul.f32 -1.442695, %v398_v26 }
 0x11e   : > { %1051 = vpow2.f32 %v949_v27 }
 0x120   : > { %v415_v62 = vpop.f32.mrf.mxu3 }
 0x121   : > { %v400_v29 = vpop.f32.mrf.mxu0  ;;  %v416_v7 = vadd.f32 %v415_v62, %v348_v60  ;;  %v527_v60 = vld [vmem:[%s1566_s3 + $0x30] sm:$0xff]  ;;  %v528_v62 = vld [vmem:[%s1566_s3 + $0x38] sm:$0xff] }
 0x122   : > { %v401_v30 = vadd.f32 %v400_v29, %v323_v28  ;;  %v353_v28 = vpop.permute.xlu1 %352 }
 0x124   : > { %v1052_v31 = vpop.eup %1051  ;;  %v950_v32 = vmul.f32 -1.442695, %v401_v30 }
 0x125   : > { %v433_v33 = vadd.f32 1.0, %v1052_v31 }
 0x126   : > { %1053 = vpow2.f32 %v950_v32  ;;  %v412_v32 = vpop.f32.mrf.mxu2 }
 0x127   : > { %1055 = vrcp.f32 %v433_v33  ;;  %vm442_vm5 = vweird.f32 %v433_v33  ;;  %v448_v0 = vand.u32 2147483648, %v433_v33  ;;  %v446_v2 = vand.u32 2147483647, %v433_v33 }
 0x129   : > { %v403_v35 = vpop.f32.mrf.mxu0  ;;  %v449_v14 = vor.u32 1.1754944e-38, %v448_v0  ;;  %vm447_vm11 = vcmp.eq.f32.partialorder %v446_v2, 8.507059e+37  ;;  %v525_v0 = vld [vmem:[%s1566_s3 + $0x20] sm:$0xff] }
 0x12a   : > { %v404_v36 = vadd.f32 %v403_v35, %v328_v34  ;;  %v418_v34 = vpop.f32.mrf.mxu3 }
 0x12c   : > { %v1054_v37 = vpop.eup %1053  ;;  %v951_v38 = vmul.f32 -1.442695, %v404_v36 }
 0x12d   : > { %v1333_v39 = vadd.f32 1.0, %v1054_v37  ;;  %v1056_v41 = vpop.eup %1055 }
 0x12e   : > { %1057 = vpow2.f32 %v951_v38  ;;  %v438_v46 = vmul.f32 %v1056_v41, %v433_v33  ;;  %vm443_vm4 = vweird.f32 %v1056_v41  ;;  %v413_v38 = vadd.f32 %v412_v32, %v1338_v50  ;;  %v533_v50 = vld [vmem:[%s1567_s4 + $0x20] sm:$0xff] }
 0x12f   : > { %1059 = vrcp.f32 %v1333_v39  ;;  %vm1346_vm7 = vmor %vm442_vm5, %vm443_vm4  ;;  %vm457_vm13 = vweird.f32 %v1333_v39  ;;  %v463_v18 = vand.u32 2147483648, %v1333_v39  ;;  %v461_v22 = vand.u32 2147483647, %v1333_v39 }
 0x130   : > { %v439_v49 = vsub.f32 1.0, %v438_v46  ;;  %v532_v46 = vld [vmem:[%s1567_s4 + $0x18] sm:$0xff] }
 0x131   : > { %v406_v42 = vpop.f32.mrf.mxu0  ;;  %v464_v33 = vor.u32 1.1754944e-38, %v463_v18  ;;  %vm462_vm1 = vcmp.eq.f32.partialorder %v461_v22, 8.507059e+37 }
 0x132   : > { %v407_v43 = vadd.f32 %v406_v42, %v333_v40  ;;  %v440_v53 = vmul.f32 %v1056_v41, %v439_v49  ;;  %v529_v49 = vld [vmem:[%s1567_s4] sm:$0xff] }
 0x134   : > { %v1058_v44 = vpop.eup %1057  ;;  %v952_v45 = vmul.f32 -1.442695, %v407_v43  ;;  %v441_v58 = vadd.f32 %v1056_v41, %v440_v53 }
 0x135   : > { %v435_v47 = vadd.f32 1.0, %v1058_v44  ;;  %v1336_v48 = vpop.eup %1059 }
 0x136   : > { %1061 = vpow2.f32 %v952_v45  ;;  %v453_v51 = vmul.f32 %v1336_v48, %v1333_v39  ;;  %v445_v10 = vsel %vm1346_vm7, %v1056_v41, %v441_v58  ;;  %vm458_vm9 = vweird.f32 %v1336_v48  ;;  %v530_v45 = vld [vmem:[%s1567_s4 + $0x8] sm:$0xff] }
 0x137   : > { %1063 = vrcp.f32 %v435_v47  ;;  %v478_v1 = vand.u32 2147483648, %v435_v47  ;;  %v476_v4 = vand.u32 2147483647, %v435_v47  ;;  %vm472_vm8 = vweird.f32 %v435_v47  ;;  %vm1357_vm14 = vmor %vm457_vm13, %vm458_vm9 }
 0x138   : > { %v454_v55 = vsub.f32 1.0, %v453_v51  ;;  %v450_v19 = vsel %vm447_vm11, %v449_v14, %v445_v10  ;;  %v419_v39 = vadd.f32 %v418_v34, %v353_v28  ;;  %v535_v51 = vld [vmem:[%s1567_s4 + $0x30] sm:$0xff] }
 0x139   : > { %v409_v63 = vpop.f32.mrf.mxu0  ;;  %v479_v15 = vor.u32 1.1754944e-38, %v478_v1  ;;  %vm477_vm12 = vcmp.eq.f32.partialorder %v476_v4, 8.507059e+37 }
 0x13a   : > { %v455_v61 = vmul.f32 %v1336_v48, %v454_v55  ;;  %v410_v8 = vadd.f32 %v409_v63, %v338_v5  ;;  %v524_v63 = vld [vmem:[%s1566_s3 + $0x18] sm:$0xff] }
 0x13c   : > { %v1062_v52 = vpop.eup %1061  ;;  %v456_v13 = vadd.f32 %v1336_v48, %v455_v61  ;;  %v497_v23 = vmul.f32 %v450_v19, %v410_v8  ;;  %v523_v61 = vld [vmem:[%s1566_s3 + $0x10] sm:$0xff] }
 0x13d   : > { %v1064_v54 = vpop.eup %1063  ;;  %v1342_v56 = vadd.f32 1.0, %v1062_v52  ;;  %v536_v52 = vld [vmem:[%s1567_s4 + $0x38] sm:$0xff] }
 0x13e   : > { %v468_v57 = vmul.f32 %v1064_v54, %v435_v47  ;;  %vm473_vm6 = vweird.f32 %v1064_v54  ;;  %v460_v26 = vsel %vm1357_vm14, %v1336_v48, %v456_v13  ;;  %v531_v47 = vld [vmem:[%s1567_s4 + $0x10] sm:$0xff]  ;;  %v534_v48 = vld [vmem:[%s1567_s4 + $0x28] sm:$0xff] }
 0x13f   : > { %1065 = vrcp.f32 %v1342_v56  ;;  %vm474_vm10 = vmor %vm472_vm8, %vm473_vm6  ;;  %v493_v27 = vand.u32 2147483648, %v1342_v56  ;;  %v491_v30 = vand.u32 2147483647, %v1342_v56  ;;  %vm487_vm4 = vweird.f32 %v1342_v56 }
 0x140   : > { %v469_v59 = vsub.f32 1.0, %v468_v57  ;;  %v465_v36 = vsel %vm462_vm1, %v464_v33, %v460_v26  ;;  %v526_v57 = vld [vmem:[%s1566_s3 + $0x28] sm:$0xff] }
 0x141   : > { %v494_v37 = vor.u32 1.1754944e-38, %v493_v27  ;;  %vm492_vm6 = vcmp.eq.f32.partialorder %v491_v30, 8.507059e+37  ;;  %v498_v42 = vmul.f32 %v465_v36, %v413_v38 }
 0x142   : > { %v470_v3 = vmul.f32 %v1064_v54, %v469_v59  ;;  %v522_v59 = vld [vmem:[%s1566_s3 + $0x8] sm:$0xff] }
 0x144   : > { %v471_v11 = vadd.f32 %v1064_v54, %v470_v3 }
 0x145   : > { %v1066_v12 = vpop.eup %1065 }
 0x146   : > { %v483_v16 = vmul.f32 %v1066_v12, %v1342_v56  ;;  %v475_v17 = vsel %vm474_vm10, %v1064_v54, %v471_v11  ;;  %vm488_vm15 = vweird.f32 %v1066_v12  ;;  %v521_v56 = vld [vmem:[%s1566_s3] sm:$0xff] }
 0x147   : > { %v480_v20 = vsel %vm477_vm12, %v479_v15, %v475_v17  ;;  %vm489_vm5 = vmor %vm487_vm4, %vm488_vm15 }
 0x148   : > { %v484_v24 = vsub.f32 1.0, %v483_v16  ;;  %v499_v25 = vmul.f32 %v480_v20, %v416_v7 }
 0x14a   : > { %v485_v29 = vmul.f32 %v1066_v12, %v484_v24  ;;  %v501_v31 = vmax.f32 %v497_v23, %v499_v25 }
 0x14c   : > { %v486_v35 = vadd.f32 %v1066_v12, %v485_v29  ;;  %513 = vrot.lane.b32.xlu2 %v501_v31, %s1155_s18 }
 0x14e   : > { %v490_v40 = vsel %vm489_vm5, %v1066_v12, %v486_v35 }
 0x14f   : > { %v495_v41 = vsel %vm492_vm6, %v494_v37, %v490_v40 }
 0x150   : > { %v500_v43 = vmul.f32 %v495_v41, %v419_v39 }
 0x152   : > { %v502_v44 = vmax.f32 %v498_v42, %v500_v43 }
 0x154   : > { %507 = vrot.lane.b32.xlu0 %v502_v44, %s1156_s19  ;;  %515 = vrot.lane.b32.xlu1 %v502_v44, %s1155_s18 }
 0x155   : > { %544 = vperm.xlu2 %1048, %v530_v45  }
 0x15c   : > { %554 = vperm.xlu0 %1049, %v532_v46   ;;  %505 = vrot.lane.b32.xlu1 %v501_v31, %s1156_s19 }
 0x15d   : > { %549 = vperm.xlu2 %1048, %v531_v47  }
 0x164   : > { %564 = vperm.xlu0 %1049, %v534_v48   ;;  %539 = vperm.xlu1 %1050, %v529_v49  }
 0x165   : > { %559 = vperm.xlu2 %1048, %v533_v50  }
 0x16c   : > { %569 = vperm.xlu0 %1049, %v535_v51   ;;  %574 = vperm.xlu1 %1050, %v536_v52  }
 0x1a6   : > { %v514_v54 = vpop.permute.xlu2 %513 }
 0x1af   : > { %v545_v5 = vpop.permute.xlu2 %544 }
 0x1b7   : > { %v550_v12 = vpop.permute.xlu2 %549 }
 0x1bf   : > { %v560_v48 = vpop.permute.xlu2 %559 }
 0x1c6   : > { %v516_v53 = vpop.permute.xlu1 %515  ;;  %v508_v55 = vpop.permute.xlu0 %507 }
 0x1c7   : > { %953 = vmatpush.msk.msra.mxu1 %vm296_vm0, %v516_v53  ;;  %1000 = vmatpush.msk.msrb.mxu3 %vm296_vm0, %v516_v53 }
 0x1c9   : > { %954 = vmatpush.msk.msra.mxu1 %vm296_vm0, %v514_v54  ;;  %1001 = vmatpush.msk.msrb.mxu3 %vm296_vm0, %v514_v54 }
 0x1cb   : > { %613 = vmatpush.msra.mxu1 %v502_v44  ;;  %1002 = vmatpush.msrb.mxu3 %v502_v44 }
 0x1cd   : > { %614 = vmatpush.msra.mxu1 %v501_v31  ;;  %1003 = vmatpush.msrb.mxu3 %v501_v31 }
 0x1ce   : > { %v506_v58 = vpop.permute.xlu1 %505  ;;  %v555_v18 = vpop.permute.xlu0 %554 }
 0x1cf   : > { %956 = vmatpush.msk.msra.mxu1 %vm1270_vm2, %v508_v55  ;;  %1004 = vmatpush.msk.msrb.mxu3 %vm1270_vm2, %v508_v55 }
 0x1d1   : > { %958 = vmatpush.msk.msra.mxu1 %vm1270_vm2, %v506_v58  ;;  %1005 = vmatpush.msk.msrb.mxu3 %vm1270_vm2, %v506_v58 }
 0x1d2   : > { %959 = vmatmul.msk.f32.vlgmr.msra.gmra.mxu1 %vm355_vm3, %v521_v56  ;;  %964 = vmatmul.msk.f32.vlgmr.msrb.gmra.mxu3 %vm355_vm3, %v526_v57 }
 0x1d6   : > { %v540_v1 = vpop.permute.xlu1 %539  ;;  %v1448_v28 = vpop.permute.xlu0 %564 }
 0x1da   : > { %960 = vmatmul.msk.f32.gmra.mxu1 %vm355_vm3, %v522_v59  ;;  %965 = vmatmul.msk.f32.gmra.mxu3 %vm355_vm3, %v527_v60 }
 0x1de   : > { %v570_v44 = vpop.permute.xlu0 %569 }
 0x1e2   : > { %961 = vmatmul.msk.f32.gmra.mxu1 %vm355_vm3, %v523_v61  ;;  %966 = vmatmul.msk.f32.gmra.mxu3 %vm355_vm3, %v528_v62 }
 0x1ea   : > { %962 = vmatmul.msk.f32.gmra.mxu1 %vm355_vm3, %v524_v63 }
 0x1f2   : > { %963 = vmatmul.msk.f32.gmra.mxu1 %vm355_vm3, %v525_v0 }
 0x24f   : > { %v618_v2 = vpop.f32.mrf.mxu1 }
 0x250   : > { %v619_v3 = vadd.f32 %v618_v2, %v540_v1 }
 0x252   : > { %v967_v4 = vmul.f32 -1.442695, %v619_v3 }
 0x254   : > { %1067 = vpow2.f32 %v967_v4 }
 0x255   : > { %v1446_v27 = vpop.f32.mrf.mxu3 }
 0x257   : > { %v621_v6 = vpop.f32.mrf.mxu1 }
 0x258   : > { %v622_v7 = vadd.f32 %v621_v6, %v545_v5 }
 0x25a   : > { %v1068_v8 = vpop.eup %1067  ;;  %v968_v10 = vmul.f32 -1.442695, %v622_v7 }
 0x25b   : > { %v654_v11 = vadd.f32 1.0, %v1068_v8 }
 0x25c   : > { %1069 = vpow2.f32 %v968_v10 }
 0x25d   : > { %1071 = vrcp.f32 %v654_v11  ;;  %v636_v37 = vpop.f32.mrf.mxu3  ;;  %vm663_vm8 = vweird.f32 %v654_v11  ;;  %v669_v41 = vand.u32 2147483648, %v654_v11  ;;  %v667_v45 = vand.u32 2147483647, %v654_v11 }
 0x25e   : > { %v637_v49 = vadd.f32 %v636_v37, %v570_v44 }
 0x25f   : > { %v624_v13 = vpop.f32.mrf.mxu1  ;;  %v670_v55 = vor.u32 1.1754944e-38, %v669_v41  ;;  %vm668_vm14 = vcmp.eq.f32.partialorder %v667_v45, 8.507059e+37 }
 0x260   : > { %v625_v14 = vadd.f32 %v624_v13, %v550_v12  ;;  %v575_v13 = vpop.permute.xlu1 %574 }
 0x262   : > { %v1070_v15 = vpop.eup %1069  ;;  %v969_v16 = vmul.f32 -1.442695, %v625_v14 }
 0x263   : > { %v1441_v17 = vadd.f32 1.0, %v1070_v15  ;;  %v1072_v19 = vpop.eup %1071 }
 0x264   : > { %1073 = vpow2.f32 %v969_v16  ;;  %v659_v24 = vmul.f32 %v1072_v19, %v654_v11  ;;  %vm664_vm7 = vweird.f32 %v1072_v19  ;;  %v634_v16 = vadd.f32 %v1446_v27, %v1448_v28 }
 0x265   : > { %1075 = vrcp.f32 %v1441_v17  ;;  %vm1456_vm10 = vmor %vm663_vm8, %vm664_vm7  ;;  %vm678_vm1 = vweird.f32 %v1441_v17  ;;  %v684_v62 = vand.u32 2147483648, %v1441_v17  ;;  %v682_v3 = vand.u32 2147483647, %v1441_v17  ;;  %v639_v10 = vpop.f32.mrf.mxu3 }
 0x266   : > { %v660_v29 = vsub.f32 1.0, %v659_v24  ;;  %v747_v24 = vld [vmem:[%s1569_s6 + $0x8] sm:$0xff] }
 0x267   : > { %v627_v20 = vpop.f32.mrf.mxu1  ;;  %v685_v11 = vor.u32 1.1754944e-38, %v684_v62  ;;  %vm683_vm6 = vcmp.eq.f32.partialorder %v682_v3, 8.507059e+37 }
 0x268   : > { %v628_v21 = vadd.f32 %v627_v20, %v555_v18  ;;  %v661_v32 = vmul.f32 %v1072_v19, %v660_v29 }
 0x26a   : > { %v1074_v22 = vpop.eup %1073  ;;  %v970_v23 = vmul.f32 -1.442695, %v628_v21  ;;  %v662_v39 = vadd.f32 %v1072_v19, %v661_v32  ;;  %v743_v32 = vld [vmem:[%s1568_s5 + $0x8] sm:$0xff] }
 0x26b   : > { %v656_v25 = vadd.f32 1.0, %v1074_v22  ;;  %v1444_v26 = vpop.eup %1075 }
 0x26c   : > { %1077 = vpow2.f32 %v970_v23  ;;  %v674_v30 = vmul.f32 %v1444_v26, %v1441_v17  ;;  %v666_v52 = vsel %vm1456_vm10, %v1072_v19, %v662_v39  ;;  %vm679_vm13 = vweird.f32 %v1444_v26  ;;  %v746_v23 = vld [vmem:[%s1569_s6] sm:$0xff] }
 0x26d   : > { %1079 = vrcp.f32 %v656_v25  ;;  %v699_v42 = vand.u32 2147483648, %v656_v25  ;;  %v697_v47 = vand.u32 2147483647, %v656_v25  ;;  %vm693_vm11 = vweird.f32 %v656_v25  ;;  %vm1467_vm4 = vmor %vm678_vm1, %vm679_vm13 }
 0x26e   : > { %v675_v34 = vsub.f32 1.0, %v674_v30  ;;  %v671_v60 = vsel %vm668_vm14, %v670_v55, %v666_v52  ;;  %v640_v17 = vadd.f32 %v639_v10, %v575_v13  ;;  %v742_v30 = vld [vmem:[%s1568_s5] sm:$0xff] }
 0x26f   : > { %v630_v40 = vpop.f32.mrf.mxu1  ;;  %v700_v56 = vor.u32 1.1754944e-38, %v699_v42  ;;  %vm698_vm15 = vcmp.eq.f32.partialorder %v697_v47, 8.507059e+37 }
 0x270   : > { %v676_v43 = vmul.f32 %v1444_v26, %v675_v34  ;;  %v631_v51 = vadd.f32 %v630_v40, %v560_v48  ;;  %v745_v34 = vld [vmem:[%s1568_s5 + $0x18] sm:$0xff] }
 0x272   : > { %v1078_v31 = vpop.eup %1077  ;;  %v677_v57 = vadd.f32 %v1444_v26, %v676_v43  ;;  %v718_v0 = vmul.f32 %v671_v60, %v631_v51 }
 0x273   : > { %v1080_v33 = vpop.eup %1079  ;;  %v1452_v35 = vadd.f32 1.0, %v1078_v31 }
 0x274   : > { %v689_v36 = vmul.f32 %v1080_v33, %v656_v25  ;;  %vm694_vm9 = vweird.f32 %v1080_v33  ;;  %v681_v4 = vsel %vm1467_vm4, %v1444_v26, %v677_v57  ;;  %v749_v25 = vld [vmem:[%s1569_s6 + $0x18] sm:$0xff]  ;;  %v748_v26 = vld [vmem:[%s1569_s6 + $0x10] sm:$0xff] }
 0x275   : > { %1081 = vrcp.f32 %v1452_v35  ;;  %vm695_vm12 = vmor %vm693_vm11, %vm694_vm9  ;;  %v714_v5 = vand.u32 2147483648, %v1452_v35  ;;  %v712_v8 = vand.u32 2147483647, %v1452_v35  ;;  %vm708_vm7 = vweird.f32 %v1452_v35 }
 0x276   : > { %v690_v38 = vsub.f32 1.0, %v689_v36  ;;  %v686_v14 = vsel %vm683_vm6, %v685_v11, %v681_v4 }
 0x277   : > { %v715_v15 = vor.u32 1.1754944e-38, %v714_v5  ;;  %vm713_vm9 = vcmp.eq.f32.partialorder %v712_v8, 8.507059e+37  ;;  %v719_v20 = vmul.f32 %v686_v14, %v634_v16 }
 0x278   : > { %v691_v46 = vmul.f32 %v1080_v33, %v690_v38 }
 0x27a   : > { %v692_v53 = vadd.f32 %v1080_v33, %v691_v46 }
 0x27b   : > { %v1082_v54 = vpop.eup %1081 }
 0x27c   : > { %v704_v58 = vmul.f32 %v1082_v54, %v1452_v35  ;;  %v696_v59 = vsel %vm695_vm12, %v1080_v33, %v692_v53  ;;  %vm709_vm5 = vweird.f32 %v1082_v54  ;;  %v744_v33 = vld [vmem:[%s1568_s5 + $0x10] sm:$0xff] }
 0x27d   : > { %v701_v61 = vsel %vm698_vm15, %v700_v56, %v696_v59  ;;  %vm710_vm8 = vmor %vm708_vm7, %vm709_vm5 }
 0x27e   : > { %v705_v63 = vsub.f32 1.0, %v704_v58  ;;  %v720_v1 = vmul.f32 %v701_v61, %v637_v49 }
 0x280   : > { %v722_v6 = vmax.f32 %v718_v0, %v720_v1  ;;  %v706_v7 = vmul.f32 %v1082_v54, %v705_v63 }
 0x282   : > { %734 = vrot.lane.b32.xlu2 %v722_v6, %s1155_s18  ;;  %v707_v12 = vadd.f32 %v1082_v54, %v706_v7 }
 0x284   : > { %v711_v18 = vsel %vm710_vm8, %v1082_v54, %v707_v12 }
 0x285   : > { %v716_v19 = vsel %vm713_vm9, %v715_v15, %v711_v18 }
 0x286   : > { %v721_v21 = vmul.f32 %v716_v19, %v640_v17 }
 0x288   : > { %v723_v22 = vmax.f32 %v719_v20, %v721_v21 }
 0x28a   : > { %728 = vrot.lane.b32.xlu0 %v723_v22, %s1156_s19  ;;  %736 = vrot.lane.b32.xlu1 %v723_v22, %s1155_s18  ;;  %s866_s18 = sshll.u32 %s271_s28, 4  ;;  %s867_s18 = int_to_ptr.vmem [resolvable:$true] %s866_s18 }
 0x28b   : > { %752 = vperm.xlu2 %1048, %v746_v23  }
 0x292   : > { %757 = vperm.xlu0 %1049, %v747_v24   ;;  %726 = vrot.lane.b32.xlu1 %v722_v6, %s1156_s19  ;;  %s868_s19 = sshll.u32 %s864_s17, 4  ;;  %s869_s19 = int_to_ptr.hbm [resolvable:$true] %s868_s19 }
 0x293   : > { %767 = vperm.xlu2 %1048, %v749_v25   ;;  %s1105_s21 = sshra.s32 %s869_s19, 4  ;;  %s1106_s21 = int_to_ptr.hbm [resolvable:$true] %s1105_s21 }
 0x294   : > { %s1107_s22 = scalar_lea.hbm %s1106_s21, 8  ;;  %p1112_p0 = scmp.lt.s32.totalorder %s1106_s21, %s1570_s7 }
 0x295   : > { %p1108_p11 = scmp.ne.s32.totalorder %s1106_s21, %s1107_s22  ;;  %p1113_p1 = scmp.lt.s32.totalorder %s1111_s8, %s1107_s22 }
 0x297   : > { %p1109_p12 = pnand %p1108_p11, %p1236_p5  ;;  %p1114_p2 = por %p1113_p1, %p1112_p0 }
 0x299   : > { %p1110_p13 = pneg %p1109_p12 }
 0x29a   : > { %762 = vperm.xlu1 %1050, %v748_v26  }
 0x29b   : > { %p1115_p3 = pnand %p1114_p2, %p1110_p13 }
 0x2dc   : > { %v735_v28 = vpop.permute.xlu2 %734 }
 0x2e5   : > { %v753_v9 = vpop.permute.xlu2 %752 }
 0x2ed   : > { %v768_v1 = vpop.permute.xlu2 %767 }
 0x2fc   : > { %v737_v27 = vpop.permute.xlu1 %736  ;;  %v729_v29 = vpop.permute.xlu0 %728 }
 0x2fd   : > { %971 = vmatpush.msk.msrb.mxu2 %vm296_vm0, %v737_v27 }
 0x2ff   : > { %972 = vmatpush.msk.msrb.mxu2 %vm296_vm0, %v735_v28 }
 0x301   : > { %794 = vmatpush.msrb.mxu2 %v723_v22 }
 0x303   : > { %795 = vmatpush.msrb.mxu2 %v722_v6 }
 0x304   : > { %v727_v31 = vpop.permute.xlu1 %726  ;;  %v758_v38 = vpop.permute.xlu0 %757 }
 0x305   : > { %974 = vmatpush.msk.msrb.mxu2 %vm1270_vm2, %v729_v29 }
 0x307   : > { %976 = vmatpush.msk.msrb.mxu2 %vm1270_vm2, %v727_v31 }
 0x308   : > { %977 = vmatmul.msk.f32.vlgmr.msrb.gmra.mxu2 %vm355_vm3, %v742_v30 }
 0x30c   : > { %v763_v2 = vpop.permute.xlu1 %762 }
 0x310   : > { %978 = vmatmul.msk.f32.gmra.mxu2 %vm355_vm3, %v743_v32 }
 0x318   : > { %979 = vmatmul.msk.f32.gmra.mxu2 %vm355_vm3, %v744_v33 }
 0x320   : > { %980 = vmatmul.msk.f32.gmra.mxu2 %vm355_vm3, %v745_v34 }
 0x38b   : > { %v799_v35 = vpop.f32.mrf.mxu2 }
 0x38c   : > { %v800_v36 = vadd.f32 %v799_v35, %v753_v9 }
 0x38e   : > { %v981_v37 = vmul.f32 -1.442695, %v800_v36 }
 0x390   : > { %1083 = vpow2.f32 %v981_v37 }
 0x393   : > { %v802_v39 = vpop.f32.mrf.mxu2 }
 0x394   : > { %v803_v40 = vadd.f32 %v802_v39, %v758_v38 }
 0x396   : > { %v1084_v41 = vpop.eup %1083  ;;  %v982_v42 = vmul.f32 -1.442695, %v803_v40 }
 0x397   : > { %v817_v43 = vadd.f32 1.0, %v1084_v41 }
 0x398   : > { %1085 = vpow2.f32 %v982_v42 }
 0x399   : > { %1087 = vrcp.f32 %v817_v43  ;;  %v830_v54 = vand.u32 2147483648, %v817_v43  ;;  %vm824_vm2 = vweird.f32 %v817_v43  ;;  %v828_v55 = vand.u32 2147483647, %v817_v43 }
 0x39b   : > { %v805_v49 = vpop.f32.mrf.mxu2  ;;  %v831_v62 = vor.u32 1.1754944e-38, %v830_v54  ;;  %vm829_vm11 = vcmp.eq.f32.partialorder %v828_v55, 8.507059e+37 }
 0x39c   : > { %v806_v5 = vadd.f32 %v805_v49, %v763_v2 }
 0x39e   : > { %v1086_v44 = vpop.eup %1085 }
 0x39f   : > { %v1088_v45 = vpop.eup %1087  ;;  %v818_v46 = vadd.f32 1.0, %v1086_v44 }
 0x3a0   : > { %v820_v47 = vmul.f32 %v1088_v45, %v817_v43  ;;  %vm825_vm0 = vweird.f32 %v1088_v45 }
 0x3a1   : > { %1089 = vrcp.f32 %v818_v46  ;;  %vm1519_vm3 = vmor %vm824_vm2, %vm825_vm0  ;;  %v845_v58 = vand.u32 2147483648, %v818_v46  ;;  %v843_v61 = vand.u32 2147483647, %v818_v46  ;;  %vm839_vm12 = vweird.f32 %v818_v46 }
 0x3a2   : > { %v821_v48 = vsub.f32 1.0, %v820_v47 }
 0x3a3   : > { %v808_v63 = vpop.f32.mrf.mxu2  ;;  %v846_v4 = vor.u32 1.1754944e-38, %v845_v58  ;;  %vm844_vm14 = vcmp.eq.f32.partialorder %v843_v61, 8.507059e+37 }
 0x3a4   : > { %v822_v50 = vmul.f32 %v1088_v45, %v821_v48  ;;  %v809_v6 = vadd.f32 %v808_v63, %v768_v1 }
 0x3a6   : > { %v823_v52 = vadd.f32 %v1088_v45, %v822_v50 }
 0x3a7   : > { %v1090_v51 = vpop.eup %1089 }
 0x3a8   : > { %v835_v53 = vmul.f32 %v1090_v51, %v818_v46  ;;  %v827_v59 = vsel %vm1519_vm3, %v1088_v45, %v823_v52  ;;  %vm840_vm10 = vweird.f32 %v1090_v51 }
 0x3a9   : > { %v832_v3 = vsel %vm829_vm11, %v831_v62, %v827_v59  ;;  %vm841_vm13 = vmor %vm839_vm12, %vm840_vm10 }
 0x3aa   : > { %v836_v56 = vsub.f32 1.0, %v835_v53  ;;  %v849_v10 = vmul.f32 %v832_v3, %v806_v5 }
 0x3ac   : > { %v837_v60 = vmul.f32 %v1090_v51, %v836_v56 }
 0x3ae   : > { %v838_v0 = vadd.f32 %v1090_v51, %v837_v60 }
 0x3b0   : > { %v842_v7 = vsel %vm841_vm13, %v1090_v51, %v838_v0 }
 0x3b1   : > { %v847_v8 = vsel %vm844_vm14, %v846_v4, %v842_v7 }
 0x3b2   : > { %v850_v11 = vmul.f32 %v847_v8, %v809_v6 }
 0x3b4   : > { %v851_v12 = vmax.f32 %v849_v10, %v850_v11 }
 0x3b6   : > { %852 = vst [vmem:[%s271_s28] sm:$0xff] %v851_v12 }
 0x3b7   : > { %1118 = shalt.err (!%p1115_p3)
}
 0x3b8   : > { %1006 = dma.vmem_to_hbm [thread:$0]  (%p1236_p5), %s867_s18, 128, %s869_s19, %s854_s20  }
 0x3b9 PF: > { %p1012_p4 = scmp.ge.s32.totalorder %s1153_s27, 2  ;;  %s880_s9 = sand.u32 1, %s1141_s24  }
 0x3ba   : > { %s881_s15 = scalar_lea.sflag [#allocation3], %s880_s9 }
 0x3bb   : > { %p1009_p7 = pnand %p1012_p4, %p1240_p6 }
 0x3bd   : > { %p1010_p8 = pneg %p1009_p7 }
 0x3bf   : > { %1136 = dma.done.wait (%p1010_p8), %s881_s15, 128  }
 0x3c0   : > { %1138 = vsyncadd (%p1010_p8), %s881_s15, 4294967168  ;;  %p17_p9 = scmp.ge.s32.totalorder %s1223_s30, 4   ;;  %s1585_s24 = smov %s1145_s25 }
 0x3c1   : > { %s1586_s25 = smov %s1149_s26  ;;  %s1587_s26 = smov %s1234_s10 }
 0x3c2   : > { %s1588_s27 = smov %s1223_s30  ;;  %19 = sbr.rel (!%p17_p9) target bundleno = 3 (0x3), region = 83 }
 0x3c7   :  { %887 = vsyncpa [#allocation3], 1 }
 0x3c8   :  { %889 = vsyncpa [#allocation3 + $0x1], 1 }

</bundles_post_ra>
